<compile_context>
chip_gen: v7x
topology: tpu7x:2x2x1
jax: 0.10.0
libtpu: 0.0.40
codegen_flags: <defaults>
</compile_context>

<pallas_src>
import jax
import jax.numpy as jnp
from jax.experimental import pallas as pl
from jax.experimental.pallas import tpu as pltpu

# ---- problem sizes (small, consistent with the module) -----------------
N, CIN, H, W = 2, 4, 16, 16        # input images, NCHW on the torch side
COUT = 32                          # backbone out_features
BOTTLENECK = 16                    # bottleneck_dim
KH = KW = 3                        # synthetic backbone conv kernel
K_IM2COL = KH * KW * CIN           # 36  raw im2col contraction depth
K_PAD = 128                        # contraction zero-padded to a full lane group
ROWS = N * H * W                   # 512 rows: whole batch in one matmul
HW = H * W                         # 256 pixels per image


def gnet_kernel(pT_ref, wc_ref, bc_ref, pool_ref, wf_ref, bf_ref, o_ref):
    """Fused conv (+bias, ReLU) -> global avg pool -> linear (+bias, ReLU).

    Everything is kept in a lane-dense transposed layout (channels on
    sublanes, rows/batch on lanes):

    pT_ref   : (K_PAD, ROWS)        zero-padded im2col patches, transposed
    wc_ref   : (COUT, K_PAD)        conv weight, (cout, kh*kw*cin) zero-padded
    bc_ref   : (COUT, 1)            conv bias column
    pool_ref : (ROWS, N)            constant block pooling matrix (1/(H*W))
    wf_ref   : (BOTTLENECK, COUT)   bottleneck weight (torch out x in layout)
    bf_ref   : (BOTTLENECK, 1)      bottleneck bias column
    o_ref    : (BOTTLENECK, N)      transposed output features
    """
    # Conv as a single K=128 MXU pass; result (32, 512) is 16 fully packed vregs.
    feat_t = jnp.dot(wc_ref[...], pT_ref[...], preferred_element_type=jnp.float32)
    feat_t = jnp.maximum(feat_t + bc_ref[...], 0.0)           # conv bias + ReLU

    # AdaptiveAvgPool2d((1,1)) + Flatten as a matmul against the constant
    # block pooling matrix -> (COUT, N), no cross-sublane reduction chain.
    pooled_t = jnp.dot(feat_t, pool_ref[...], preferred_element_type=jnp.float32)

    # Bottleneck Linear + ReLU, still transposed: (16, 32) @ (32, N) -> (16, N).
    y_t = jnp.dot(wf_ref[...], pooled_t, preferred_element_type=jnp.float32) + bf_ref[...]
    o_ref[...] = jnp.maximum(y_t, 0.0).astype(o_ref.dtype)


@jax.jit
def g_net_forward(x_nchw, w_conv, b_conv, w_fc, b_fc):
    """x_nchw: (N, CIN, H, W) float32 -> (N, BOTTLENECK) float32."""
    # --- im2col prep, fused into the same jit as the pallas_call -------------
    x = jnp.transpose(x_nchw, (0, 2, 3, 1))                        # NHWC
    xp = jnp.pad(x, ((0, 0), (1, 1), (1, 1), (0, 0)))              # halo pad
    taps = [xp[:, kh:kh + H, kw:kw + W, :]
            for kh in range(KH) for kw in range(KW)]
    patches = jnp.concatenate(taps, axis=-1).reshape(ROWS, K_IM2COL)   # (512, 36)

    # Transposed + zero-padded operands so the kernel sees only lane-dense,
    # (8,128)-aligned blocks.
    pT = jnp.pad(patches.T, ((0, K_PAD - K_IM2COL), (0, 0)))           # (128, 512)
    wc = jnp.pad(w_conv.reshape(K_IM2COL, COUT).T,
                 ((0, 0), (0, K_PAD - K_IM2COL)))                      # (32, 128)
    bc = b_conv.reshape(COUT, 1)                                       # (32, 1)
    wf = w_fc.T                                                        # (16, 32)
    bf = b_fc.reshape(BOTTLENECK, 1)                                   # (16, 1)

    # Constant block pooling matrix: P[r, n] = 1/(H*W) if row r belongs to
    # image n (constant-folded by XLA inside the jit).
    img_of_row = jnp.arange(ROWS, dtype=jnp.int32) // HW
    pool = (img_of_row[:, None] == jnp.arange(N, dtype=jnp.int32)[None, :]
            ).astype(jnp.float32) / HW                                 # (512, 2)

    # Single fused step for the whole batch; total resident data < 0.5 MiB so
    # no generation-specific tiling and no megacore split (2 tiny steps would
    # just duplicate fixed per-step overhead).
    y_t = pl.pallas_call(
        gnet_kernel,
        out_shape=jax.ShapeDtypeStruct((BOTTLENECK, N), jnp.float32),
        grid_spec=pltpu.PrefetchScalarGridSpec(
            num_scalar_prefetch=0,
            grid=(1,),
            in_specs=[
                pl.BlockSpec((K_PAD, ROWS), lambda i: (0, 0)),
                pl.BlockSpec((COUT, K_PAD), lambda i: (0, 0)),
                pl.BlockSpec((COUT, 1), lambda i: (0, 0)),
                pl.BlockSpec((ROWS, N), lambda i: (0, 0)),
                pl.BlockSpec((BOTTLENECK, COUT), lambda i: (0, 0)),
                pl.BlockSpec((BOTTLENECK, 1), lambda i: (0, 0)),
            ],
            out_specs=pl.BlockSpec((BOTTLENECK, N), lambda i: (0, 0)),
        ),
        compiler_params=pltpu.CompilerParams(
            dimension_semantics=("arbitrary",)),
    )(pT, wc, bc, pool, wf, bf)

    return y_t.T                                                       # (N, BOTTLENECK)


def g_net_reference(x_nchw, w_conv, b_conv, w_fc, b_fc):
    """Pure-JAX reference for correctness checking."""
    x = jnp.transpose(x_nchw, (0, 2, 3, 1))
    conv = jax.lax.conv_general_dilated(
        x, w_conv, window_strides=(1, 1), padding="SAME",
        dimension_numbers=("NHWC", "HWIO", "NHWC"))
    feat = jnp.maximum(conv + b_conv[0], 0.0)
    pooled = jnp.mean(feat, axis=(1, 2))                 # (N, COUT)
    return jnp.maximum(pooled @ w_fc + b_fc[0], 0.0)


if __name__ == "__main__":
    key = jax.random.PRNGKey(0)
    k_x, k_wc, k_bc, k_wf, k_bf = jax.random.split(key, 5)

    x = jax.random.normal(k_x, (N, CIN, H, W), dtype=jnp.float32)
    w_conv = jax.random.normal(k_wc, (KH, KW, CIN, COUT), dtype=jnp.float32) * 0.1
    b_conv = jax.random.normal(k_bc, (1, COUT), dtype=jnp.float32) * 0.1
    w_fc = jax.random.normal(k_wf, (COUT, BOTTLENECK), dtype=jnp.float32) * 0.1
    b_fc = jax.random.normal(k_bf, (1, BOTTLENECK), dtype=jnp.float32) * 0.1

    out = jax.block_until_ready(g_net_forward(x, w_conv, b_conv, w_fc, b_fc))

    ref = g_net_reference(x, w_conv, b_conv, w_fc, b_fc)
    assert out.shape == (N, BOTTLENECK)
    assert jnp.allclose(out, ref, atol=1e-4, rtol=1e-4), "mismatch vs reference"

    print("KERNEL_OK")
</pallas_src>

<mosaic_0001>
module attributes {stable_mosaic.version = 11 : i64} {
  func.func @gnet_kernel(%arg0: i32, %arg1: memref<128x512xf32, #tpu.memory_space<vmem>>, %arg2: memref<32x128xf32, #tpu.memory_space<vmem>>, %arg3: memref<32x1xf32, #tpu.memory_space<vmem>>, %arg4: memref<512x2xf32, #tpu.memory_space<vmem>>, %arg5: memref<16x32xf32, #tpu.memory_space<vmem>>, %arg6: memref<16x1xf32, #tpu.memory_space<vmem>>, %arg7: memref<16x2xf32, #tpu.memory_space<vmem>>) attributes {dimension_semantics = [#tpu.dimension_semantics<arbitrary>], iteration_bounds = array<i64: 1>, scalar_prefetch = 0 : i64, scratch_operands = 0 : i64, tpu.core_type = #tpu.core_type<tc>, window_params = [{pipeline_mode = #tpu.pipeline_mode<synchronous>, transform_indices = @transform_0, window_bounds = array<i64: 128, 512>}, {pipeline_mode = #tpu.pipeline_mode<synchronous>, transform_indices = @transform_1, window_bounds = array<i64: 32, 128>}, {pipeline_mode = #tpu.pipeline_mode<synchronous>, transform_indices = @transform_2, window_bounds = array<i64: 32, 1>}, {pipeline_mode = #tpu.pipeline_mode<synchronous>, transform_indices = @transform_3, window_bounds = array<i64: 512, 2>}, {pipeline_mode = #tpu.pipeline_mode<synchronous>, transform_indices = @transform_4, window_bounds = array<i64: 16, 32>}, {pipeline_mode = #tpu.pipeline_mode<synchronous>, transform_indices = @transform_5, window_bounds = array<i64: 16, 1>}, {pipeline_mode = #tpu.pipeline_mode<synchronous>, transform_indices = @transform_6, window_bounds = array<i64: 16, 2>}]} {
    %c0 = arith.constant 0 : index
    %c0_0 = arith.constant 0 : index
    %0 = vector.load %arg2[%c0, %c0_0] : memref<32x128xf32, #tpu.memory_space<vmem>>, vector<32x128xf32>
    %c0_1 = arith.constant 0 : index
    %c0_2 = arith.constant 0 : index
    %1 = vector.load %arg1[%c0_1, %c0_2] : memref<128x512xf32, #tpu.memory_space<vmem>>, vector<128x512xf32>
    %cst = arith.constant dense<0.000000e+00> : vector<32x512xf32>
    %2 = tpu.matmul %0, %1, %cst {dimension_numbers = #tpu.dot_dimension_numbers<[1], [0], [0], [1], [0, 0, 1, 1], [], []>} : vector<32x128xf32>, vector<128x512xf32>, vector<32x512xf32> -> vector<32x512xf32>
    %c0_3 = arith.constant 0 : index
    %c0_4 = arith.constant 0 : index
    %3 = vector.load %arg3[%c0_3, %c0_4] : memref<32x1xf32, #tpu.memory_space<vmem>>, vector<32x1xf32>
    %4 = vector.broadcast %3 : vector<32x1xf32> to vector<32x512xf32>
    %5 = arith.addf %2, %4 : vector<32x512xf32>
    %cst_5 = arith.constant 0.000000e+00 : f32
    %6 = vector.broadcast %cst_5 : f32 to vector<32x512xf32>
    %7 = arith.maximumf %5, %6 : vector<32x512xf32>
    %c0_6 = arith.constant 0 : index
    %c0_7 = arith.constant 0 : index
    %8 = vector.load %arg4[%c0_6, %c0_7] : memref<512x2xf32, #tpu.memory_space<vmem>>, vector<512x2xf32>
    %cst_8 = arith.constant dense<0.000000e+00> : vector<32x2xf32>
    %9 = tpu.matmul %7, %8, %cst_8 {dimension_numbers = #tpu.dot_dimension_numbers<[1], [0], [0], [1], [0, 0, 1, 1], [], []>} : vector<32x512xf32>, vector<512x2xf32>, vector<32x2xf32> -> vector<32x2xf32>
    %c0_9 = arith.constant 0 : index
    %c0_10 = arith.constant 0 : index
    %10 = vector.load %arg5[%c0_9, %c0_10] : memref<16x32xf32, #tpu.memory_space<vmem>>, vector<16x32xf32>
    %cst_11 = arith.constant dense<0.000000e+00> : vector<16x2xf32>
    %11 = tpu.matmul %10, %9, %cst_11 {dimension_numbers = #tpu.dot_dimension_numbers<[1], [0], [0], [1], [0, 0, 1, 1], [], []>} : vector<16x32xf32>, vector<32x2xf32>, vector<16x2xf32> -> vector<16x2xf32>
    %c0_12 = arith.constant 0 : index
    %c0_13 = arith.constant 0 : index
    %12 = vector.load %arg6[%c0_12, %c0_13] : memref<16x1xf32, #tpu.memory_space<vmem>>, vector<16x1xf32>
    %13 = vector.broadcast %12 : vector<16x1xf32> to vector<16x2xf32>
    %14 = arith.addf %11, %13 : vector<16x2xf32>
    %cst_14 = arith.constant 0.000000e+00 : f32
    %15 = vector.broadcast %cst_14 : f32 to vector<16x2xf32>
    %16 = arith.maximumf %14, %15 : vector<16x2xf32>
    %c0_15 = arith.constant 0 : index
    %c0_16 = arith.constant 0 : index
    %17 = vector.load %arg7[%c0_15, %c0_16] : memref<16x2xf32, #tpu.memory_space<vmem>>, vector<16x2xf32>
    tpu.vector_store %arg7[%c0_15, %c0_16], %16 {strides = array<i32>} : memref<16x2xf32, #tpu.memory_space<vmem>>, vector<16x2xf32>,
    return
  }
  func.func @transform_0(%arg0: i32) -> (i32, i32) {
    %c0_i32 = arith.constant 0 : i32
    %c0_i32_0 = arith.constant 0 : i32
    %c0_i32_1 = arith.constant 0 : i32
    return %c0_i32, %c0_i32_0 : i32, i32
  }
  func.func @transform_1(%arg0: i32) -> (i32, i32) {
    %c0_i32 = arith.constant 0 : i32
    %c0_i32_0 = arith.constant 0 : i32
    %c0_i32_1 = arith.constant 0 : i32
    return %c0_i32, %c0_i32_0 : i32, i32
  }
  func.func @transform_2(%arg0: i32) -> (i32, i32) {
    %c0_i32 = arith.constant 0 : i32
    %c0_i32_0 = arith.constant 0 : i32
    %c0_i32_1 = arith.constant 0 : i32
    return %c0_i32, %c0_i32_0 : i32, i32
  }
  func.func @transform_3(%arg0: i32) -> (i32, i32) {
    %c0_i32 = arith.constant 0 : i32
    %c0_i32_0 = arith.constant 0 : i32
    %c0_i32_1 = arith.constant 0 : i32
    return %c0_i32, %c0_i32_0 : i32, i32
  }
  func.func @transform_4(%arg0: i32) -> (i32, i32) {
    %c0_i32 = arith.constant 0 : i32
    %c0_i32_0 = arith.constant 0 : i32
    %c0_i32_1 = arith.constant 0 : i32
    return %c0_i32, %c0_i32_0 : i32, i32
  }
  func.func @transform_5(%arg0: i32) -> (i32, i32) {
    %c0_i32 = arith.constant 0 : i32
    %c0_i32_0 = arith.constant 0 : i32
    %c0_i32_1 = arith.constant 0 : i32
    return %c0_i32, %c0_i32_0 : i32, i32
  }
  func.func @transform_6(%arg0: i32) -> (i32, i32) {
    %c0_i32 = arith.constant 0 : i32
    %c0_i32_0 = arith.constant 0 : i32
    %c0_i32_1 = arith.constant 0 : i32
    return %c0_i32, %c0_i32_0 : i32, i32
  }
}

</mosaic_0001>

<bundles_post_ra>
// kernel: g_net_forward.1
= control target key start
LH: loop header
LB: loop body
LE: loop exit
PB: predicated region body
PF: predicated region fallthrough
CT: control target
= control target key end

     0   :  { %v895_v3 = vmov 0.0   ;;  %v896_v8 = vmov 0   ;;  %vm557_vm0 = vcmask 261120   ;;  %vm641_vm1 = vcmask 15360   ;;  %s1368_s0 = inlined_call_operand.vmem [shape: f32[128,512], index: 0, kind: input, shape index: {}]   ;;  %s1369_s2 = inlined_call_operand.vmem [shape: f32[32,1], index: 2, kind: input, shape index: {}]   ;;  %s1370_s3 = inlined_call_operand.vmem [shape: f32[512,2], index: 3, kind: input, shape index: {}]   ;;  %s1371_s5 = inlined_call_operand.vmem [shape: f32[16,1], index: 5, kind: input, shape index: {}]   ;;  %s1372_s1 = inlined_call_operand.vmem [shape: f32[32,128], index: 1, kind: input, shape index: {}]   ;;  %s1373_s4 = inlined_call_operand.vmem [shape: f32[16,32], index: 4, kind: input, shape index: {}]   ;;  %s1374_s6 = inlined_call_operand.vmem [shape: f32[16,2], index: 6, kind: output, shape index: {}]  }
   0x1   :  { %v28_v0 = vld [vmem:[%s1368_s0 + $0x8] sm:$0xff]  ;;  %v30_v2 = vld [vmem:[%s1368_s0 + $0x18] sm:$0xff]  ;;  %179 = vmatprep.mubr.f32.mxu0 %v895_v3  ;;  %268 = vmatprep.mubr.f32.mxu1 %v895_v3  ;;  %v27_v6 = vld [vmem:[%s1368_s0] sm:$0xff] }
   0x2   :  { %v32_v1 = vld [vmem:[%s1368_s0 + $0x28] sm:$0xff]  ;;  %v34_v5 = vld [vmem:[%s1368_s0 + $0x38] sm:$0xff]  ;;  %v31_v7 = vld [vmem:[%s1368_s0 + $0x20] sm:$0xff]  ;;  %893 = vset.pattern.permute.xlu0 %v896_v8  ;;  %894 = vset.pattern.permute.xlu1 %v896_v8 }
   0x3   :  { %v755_v4 = vpack.c.bf16 %v32_v1, %v28_v0  ;;  %v787_v9 = vpack.c.bf16 %v34_v5, %v30_v2  ;;  %v757_v10 = vpack.c.bf16 %v31_v7, %v27_v6  ;;  %v29_v11 = vld [vmem:[%s1368_s0 + $0x10] sm:$0xff]  ;;  %v36_v13 = vld [vmem:[%s1368_s0 + $0x48] sm:$0xff]  ;;  %v38_v16 = vld [vmem:[%s1368_s0 + $0x58] sm:$0xff] }
   0x4   :  { %v33_v12 = vld [vmem:[%s1368_s0 + $0x30] sm:$0xff]  ;;  %v40_v15 = vld [vmem:[%s1368_s0 + $0x68] sm:$0xff]  ;;  %v42_v17 = vld [vmem:[%s1368_s0 + $0x78] sm:$0xff] }
   0x5   :  { %756 = vmatprep.subr.bf16.mxu0 %v755_v4  ;;  %v789_v14 = vpack.c.bf16 %v33_v12, %v29_v11  ;;  %788 = vmatprep.subr.bf16.mxu1 %v787_v9  ;;  %v759_v18 = vpack.c.bf16 %v40_v15, %v36_v13  ;;  %v791_v19 = vpack.c.bf16 %v42_v17, %v38_v16  ;;  %v35_v20 = vld [vmem:[%s1368_s0 + $0x40] sm:$0xff]  ;;  %v37_v22 = vld [vmem:[%s1368_s0 + $0x50] sm:$0xff]  ;;  %v44_v25 = vld [vmem:[%s1368_s0 + $0x88] sm:$0xff] }
   0x6   :  { %758 = vmatpush1.bf16.msra.mxu0 %v757_v10  ;;  %v39_v21 = vld [vmem:[%s1368_s0 + $0x60] sm:$0xff]  ;;  %v41_v24 = vld [vmem:[%s1368_s0 + $0x70] sm:$0xff]  ;;  %v48_v26 = vld [vmem:[%s1368_s0 + $0xa8] sm:$0xff] }
   0x7   :  { %790 = vmatpush1.bf16.msra.mxu1 %v789_v14  ;;  %v761_v23 = vpack.c.bf16 %v39_v21, %v35_v20  ;;  %760 = vmatprep.subr.bf16.mxu0 %v759_v18  ;;  %v793_v27 = vpack.c.bf16 %v41_v24, %v37_v22  ;;  %v763_v28 = vpack.c.bf16 %v48_v26, %v44_v25  ;;  %v46_v29 = vld [vmem:[%s1368_s0 + $0x98] sm:$0xff]  ;;  %v43_v31 = vld [vmem:[%s1368_s0 + $0x80] sm:$0xff]  ;;  %v45_v34 = vld [vmem:[%s1368_s0 + $0x90] sm:$0xff] }
   0x8   :  { %792 = vmatprep.subr.bf16.mxu1 %v791_v19  ;;  %v50_v30 = vld [vmem:[%s1368_s0 + $0xb8] sm:$0xff]  ;;  %v47_v33 = vld [vmem:[%s1368_s0 + $0xa0] sm:$0xff]  ;;  %v49_v35 = vld [vmem:[%s1368_s0 + $0xb0] sm:$0xff] }
   0x9   :  { %v795_v32 = vpack.c.bf16 %v50_v30, %v46_v29  ;;  %v765_v36 = vpack.c.bf16 %v47_v33, %v43_v31  ;;  %v52_v37 = vld [vmem:[%s1368_s0 + $0xc8] sm:$0xff]  ;;  %v54_v39 = vld [vmem:[%s1368_s0 + $0xd8] sm:$0xff]  ;;  %v797_v40 = vpack.c.bf16 %v49_v35, %v45_v34  ;;  %v51_v43 = vld [vmem:[%s1368_s0 + $0xc0] sm:$0xff] }
   0xa   :  { %762 = vmatpush1.bf16.msra.mxu0 %v761_v23  ;;  %v56_v38 = vld [vmem:[%s1368_s0 + $0xe8] sm:$0xff]  ;;  %v58_v42 = vld [vmem:[%s1368_s0 + $0xf8] sm:$0xff]  ;;  %v55_v44 = vld [vmem:[%s1368_s0 + $0xe0] sm:$0xff] }
   0xb   :  { %794 = vmatpush1.bf16.msra.mxu1 %v793_v27  ;;  %764 = vmatprep.subr.bf16.mxu0 %v763_v28  ;;  %v767_v41 = vpack.c.bf16 %v56_v38, %v52_v37  ;;  %v799_v45 = vpack.c.bf16 %v58_v42, %v54_v39  ;;  %v53_v46 = vld [vmem:[%s1368_s0 + $0xd0] sm:$0xff]  ;;  %v60_v48 = vld [vmem:[%s1368_s0 + $0x108] sm:$0xff]  ;;  %v62_v50 = vld [vmem:[%s1368_s0 + $0x118] sm:$0xff]  ;;  %v769_v52 = vpack.c.bf16 %v55_v44, %v51_v43 }
   0xc   :  { %796 = vmatprep.subr.bf16.mxu1 %v795_v32  ;;  %v57_v47 = vld [vmem:[%s1368_s0 + $0xf0] sm:$0xff]  ;;  %v64_v49 = vld [vmem:[%s1368_s0 + $0x128] sm:$0xff]  ;;  %v66_v51 = vld [vmem:[%s1368_s0 + $0x138] sm:$0xff] }
   0xd   :  { %v801_v53 = vpack.c.bf16 %v57_v47, %v53_v46  ;;  %v771_v54 = vpack.c.bf16 %v64_v49, %v60_v48  ;;  %v59_v55 = vld [vmem:[%s1368_s0 + $0x100] sm:$0xff]  ;;  %v61_v57 = vld [vmem:[%s1368_s0 + $0x110] sm:$0xff]  ;;  %v803_v58 = vpack.c.bf16 %v66_v51, %v62_v50  ;;  %v68_v60 = vld [vmem:[%s1368_s0 + $0x148] sm:$0xff] }
   0xe   :  { %766 = vmatpush1.bf16.msra.mxu0 %v765_v36  ;;  %v63_v56 = vld [vmem:[%s1368_s0 + $0x120] sm:$0xff]  ;;  %v65_v59 = vld [vmem:[%s1368_s0 + $0x130] sm:$0xff]  ;;  %v72_v61 = vld [vmem:[%s1368_s0 + $0x168] sm:$0xff] }
   0xf   :  { %798 = vmatpush1.bf16.msra.mxu1 %v797_v40  ;;  %768 = vmatprep.subr.bf16.mxu0 %v767_v41  ;;  %v70_v62 = vld [vmem:[%s1368_s0 + $0x158] sm:$0xff]  ;;  %v773_v0 = vpack.c.bf16 %v63_v56, %v59_v55  ;;  %v805_v1 = vpack.c.bf16 %v65_v59, %v61_v57  ;;  %v775_v2 = vpack.c.bf16 %v72_v61, %v68_v60  ;;  %v67_v4 = vld [vmem:[%s1368_s0 + $0x140] sm:$0xff]  ;;  %v69_v6 = vld [vmem:[%s1368_s0 + $0x150] sm:$0xff] }
  0x10   :  { %800 = vmatprep.subr.bf16.mxu1 %v799_v45  ;;  %v74_v63 = vld [vmem:[%s1368_s0 + $0x178] sm:$0xff]  ;;  %v71_v5 = vld [vmem:[%s1368_s0 + $0x160] sm:$0xff]  ;;  %v73_v8 = vld [vmem:[%s1368_s0 + $0x170] sm:$0xff] }
  0x11   :  { %v807_v7 = vpack.c.bf16 %v74_v63, %v70_v62  ;;  %v76_v9 = vld [vmem:[%s1368_s0 + $0x188] sm:$0xff]  ;;  %v78_v11 = vld [vmem:[%s1368_s0 + $0x198] sm:$0xff]  ;;  %v777_v13 = vpack.c.bf16 %v71_v5, %v67_v4  ;;  %v75_v14 = vld [vmem:[%s1368_s0 + $0x180] sm:$0xff]  ;;  %v809_v15 = vpack.c.bf16 %v73_v8, %v69_v6 }
  0x12   :  { %770 = vmatpush1.bf16.msra.mxu0 %v769_v52  ;;  %v80_v10 = vld [vmem:[%s1368_s0 + $0x1a8] sm:$0xff]  ;;  %v82_v12 = vld [vmem:[%s1368_s0 + $0x1b8] sm:$0xff]  ;;  %v79_v17 = vld [vmem:[%s1368_s0 + $0x1a0] sm:$0xff] }
  0x13   :  { %802 = vmatpush1.bf16.msra.mxu1 %v801_v53  ;;  %772 = vmatprep.subr.bf16.mxu0 %v771_v54  ;;  %v779_v16 = vpack.c.bf16 %v80_v10, %v76_v9  ;;  %v77_v18 = vld [vmem:[%s1368_s0 + $0x190] sm:$0xff]  ;;  %v811_v20 = vpack.c.bf16 %v82_v12, %v78_v11  ;;  %v84_v21 = vld [vmem:[%s1368_s0 + $0x1c8] sm:$0xff]  ;;  %v91_v23 = vld [vmem:[%s1369_s2] sm:$0xff]  ;;  %v781_v27 = vpack.c.bf16 %v79_v17, %v75_v14 }
  0x14   :  { %804 = vmatprep.subr.bf16.mxu1 %v803_v58  ;;  %v81_v19 = vld [vmem:[%s1368_s0 + $0x1b0] sm:$0xff]  ;;  %v88_v22 = vld [vmem:[%s1368_s0 + $0x1e8] sm:$0xff]  ;;  %v86_v24 = vld [vmem:[%s1368_s0 + $0x1d8] sm:$0xff]  ;;  %97 = vperm.xlu0 %893, %v91_v23  }
  0x15   :  { %v90_v25 = vld [vmem:[%s1368_s0 + $0x1f8] sm:$0xff]  ;;  %v93_v26 = vld [vmem:[%s1369_s2 + $0x10] sm:$0xff]  ;;  %v83_v28 = vld [vmem:[%s1368_s0 + $0x1c0] sm:$0xff]  ;;  %v813_v30 = vpack.c.bf16 %v81_v19, %v77_v18  ;;  %v783_v31 = vpack.c.bf16 %v88_v22, %v84_v21 }
  0x16   :  { %774 = vmatpush1.bf16.msra.mxu0 %v773_v0  ;;  %v92_v29 = vld [vmem:[%s1369_s2 + $0x8] sm:$0xff]  ;;  %107 = vperm.xlu1 %894, %v93_v26   ;;  %v87_v32 = vld [vmem:[%s1368_s0 + $0x1e0] sm:$0xff]  ;;  %v85_v33 = vld [vmem:[%s1368_s0 + $0x1d0] sm:$0xff]  ;;  %v815_v35 = vpack.c.bf16 %v90_v25, %v86_v24 }
  0x17   :  { %806 = vmatpush1.bf16.msra.mxu1 %v805_v1  ;;  %776 = vmatprep.subr.bf16.mxu0 %v775_v2  ;;  %v94_v34 = vld [vmem:[%s1369_s2 + $0x18] sm:$0xff]  ;;  %v89_v36 = vld [vmem:[%s1368_s0 + $0x1f0] sm:$0xff]  ;;  %v325_v37 = vld [vmem:[%s1370_s3 + $0x80] sm:$0xff]  ;;  %v785_v41 = vpack.c.bf16 %v87_v32, %v83_v28 }
  0x18   :  { %808 = vmatprep.subr.bf16.mxu1 %v807_v7  ;;  %v326_v38 = vld [vmem:[%s1370_s3 + $0x88] sm:$0xff]  ;;  %102 = vperm.xlu0 %893, %v92_v29   ;;  %v357_v39 = vld [vmem:[%s1370_s3 + $0x180] sm:$0xff]  ;;  %v817_v43 = vpack.c.bf16 %v89_v36, %v85_v33  ;;  %v327_v51 = vld [vmem:[%s1370_s3 + $0x90] sm:$0xff] }
  0x19   :  { %v358_v40 = vld [vmem:[%s1370_s3 + $0x188] sm:$0xff]  ;;  %v545_v42 = vld [vmem:[%s1371_s5] sm:$0xff]  ;;  %v819_v45 = vpack.c.bf16 %v326_v38, %v325_v37  ;;  %v328_v52 = vld [vmem:[%s1370_s3 + $0x98] sm:$0xff] }
  0x1a   :  { %778 = vmatpush1.bf16.msra.mxu0 %v777_v13  ;;  %112 = vperm.xlu1 %894, %v94_v34   ;;  %v546_v44 = vld [vmem:[%s1371_s5 + $0x8] sm:$0xff]  ;;  %v851_v46 = vpack.c.bf16 %v358_v40, %v357_v39  ;;  %v309_v47 = vld [vmem:[%s1370_s3] sm:$0xff]  ;;  %v359_v54 = vld [vmem:[%s1370_s3 + $0x190] sm:$0xff]  ;;  %v823_v58 = vpack.c.bf16 %v328_v52, %v327_v51 }
  0x1b   :  { %810 = vmatpush1.bf16.msra.mxu1 %v809_v15  ;;  %780 = vmatprep.subr.bf16.mxu0 %v779_v16  ;;  %v310_v48 = vld [vmem:[%s1370_s3 + $0x8] sm:$0xff]  ;;  %v341_v49 = vld [vmem:[%s1370_s3 + $0x100] sm:$0xff]  ;;  %v360_v55 = vld [vmem:[%s1370_s3 + $0x198] sm:$0xff] }
  0x1c   :  { %812 = vmatprep.subr.bf16.mxu1 %v811_v20  ;;  %549 = vperm.xlu0 %893, %v545_v42   ;;  %v342_v50 = vld [vmem:[%s1370_s3 + $0x108] sm:$0xff]  ;;  %v23_v53 = vld [vmem:[%s1372_s1] sm:$0xff]  ;;  %v821_v56 = vpack.c.bf16 %v310_v48, %v309_v47  ;;  %v311_v59 = vld [vmem:[%s1370_s3 + $0x10] sm:$0xff]  ;;  %v855_v62 = vpack.c.bf16 %v360_v55, %v359_v54 }
  0x1d   :  { %v853_v57 = vpack.c.bf16 %v342_v50, %v341_v49  ;;  %v312_v60 = vld [vmem:[%s1370_s3 + $0x18] sm:$0xff]  ;;  %v343_v61 = vld [vmem:[%s1370_s3 + $0x110] sm:$0xff]  ;;  %v329_v0 = vld [vmem:[%s1370_s3 + $0xa0] sm:$0xff] }
  0x1e   :  { %782 = vmatpush1.bf16.msra.mxu0 %v781_v27  ;;  %554 = vperm.xlu1 %894, %v546_v44   ;;  %v344_v63 = vld [vmem:[%s1370_s3 + $0x118] sm:$0xff]  ;;  %v330_v1 = vld [vmem:[%s1370_s3 + $0xa8] sm:$0xff]  ;;  %v361_v4 = vld [vmem:[%s1370_s3 + $0x1a0] sm:$0xff]  ;;  %v825_v6 = vpack.c.bf16 %v312_v60, %v311_v59 }
  0x1f   :  { %814 = vmatpush1.bf16.msra.mxu1 %v813_v30  ;;  %784 = vmatprep.subr.bf16.mxu0 %v783_v31  ;;  %v24_v2 = vld [vmem:[%s1372_s1 + $0x8] sm:$0xff]  ;;  %v857_v7 = vpack.c.bf16 %v344_v63, %v343_v61  ;;  %v827_v8 = vpack.c.bf16 %v330_v1, %v329_v0  ;;  %v313_v9 = vld [vmem:[%s1370_s3 + $0x20] sm:$0xff]  ;;  %v331_v14 = vld [vmem:[%s1370_s3 + $0xb0] sm:$0xff] }
  0x20   :  { %816 = vmatprep.subr.bf16.mxu1 %v815_v35  ;;  %v362_v5 = vld [vmem:[%s1370_s3 + $0x1a8] sm:$0xff]  ;;  %v345_v11 = vld [vmem:[%s1370_s3 + $0x120] sm:$0xff]  ;;  %v332_v15 = vld [vmem:[%s1370_s3 + $0xb8] sm:$0xff] }
  0x21   :  { %v314_v10 = vld [vmem:[%s1370_s3 + $0x28] sm:$0xff]  ;;  %v859_v12 = vpack.c.bf16 %v362_v5, %v361_v4  ;;  %v25_v16 = vld [vmem:[%s1372_s1 + $0x10] sm:$0xff]  ;;  %v364_v18 = vld [vmem:[%s1370_s3 + $0x1b8] sm:$0xff]  ;;  %v831_v21 = vpack.c.bf16 %v332_v15, %v331_v14 }
  0x22   :  { %786 = vmatpush1.bf16.msra.mxu0 %v785_v41  ;;  %v346_v13 = vld [vmem:[%s1370_s3 + $0x128] sm:$0xff]  ;;  %v363_v17 = vld [vmem:[%s1370_s3 + $0x1b0] sm:$0xff]  ;;  %v829_v19 = vpack.c.bf16 %v314_v10, %v313_v9  ;;  %v316_v23 = vld [vmem:[%s1370_s3 + $0x38] sm:$0xff] }
  0x23   :  { %818 = vmatpush1.bf16.msra.mxu1 %v817_v43  ;;  %820 = vmatprep.subr.bf16.mxu0 %v819_v45  ;;  %v861_v20 = vpack.c.bf16 %v346_v13, %v345_v11  ;;  %v315_v22 = vld [vmem:[%s1370_s3 + $0x30] sm:$0xff]  ;;  %v863_v25 = vpack.c.bf16 %v364_v18, %v363_v17  ;;  %v348_v26 = vld [vmem:[%s1370_s3 + $0x138] sm:$0xff]  ;;  %v333_v27 = vld [vmem:[%s1370_s3 + $0xc0] sm:$0xff] }
  0x24   :  { %852 = vmatprep.subr.bf16.mxu1 %v851_v46  ;;  %v347_v24 = vld [vmem:[%s1370_s3 + $0x130] sm:$0xff]  ;;  %v334_v28 = vld [vmem:[%s1370_s3 + $0xc8] sm:$0xff]  ;;  %v26_v29 = vld [vmem:[%s1372_s1 + $0x18] sm:$0xff]  ;;  %v833_v32 = vpack.c.bf16 %v316_v23, %v315_v22 }
  0x25   :  { %180 = vmatmul.mubr.f32.vlgmr.msra.gmra.mrb[0].mxu0 %v23_v53  ;;  %v365_v30 = vld [vmem:[%s1370_s3 + $0x1c0] sm:$0xff]  ;;  %v366_v31 = vld [vmem:[%s1370_s3 + $0x1c8] sm:$0xff]  ;;  %v865_v33 = vpack.c.bf16 %v348_v26, %v347_v24  ;;  %v835_v34 = vpack.c.bf16 %v334_v28, %v333_v27  ;;  %v335_v39 = vld [vmem:[%s1370_s3 + $0xd0] sm:$0xff] }
  0x26   :  { %269 = vmatmul.mubr.f32.vlgmr.msra.gmra.mrb[0].mxu1 %v23_v53  ;;  %185 = vmatprep.mubr.f32.mxu0 %v895_v3  ;;  %v317_v35 = vld [vmem:[%s1370_s3 + $0x40] sm:$0xff]  ;;  %v318_v36 = vld [vmem:[%s1370_s3 + $0x48] sm:$0xff]  ;;  %v336_v40 = vld [vmem:[%s1370_s3 + $0xd8] sm:$0xff] }
  0x27   :  { %274 = vmatprep.mubr.f32.mxu1 %v895_v3  ;;  %822 = vmatpush3.bf16.msra.mxu0 %v821_v56  ;;  %v349_v37 = vld [vmem:[%s1370_s3 + $0x140] sm:$0xff]  ;;  %v350_v38 = vld [vmem:[%s1370_s3 + $0x148] sm:$0xff]  ;;  %v367_v41 = vld [vmem:[%s1370_s3 + $0x1d0] sm:$0xff]  ;;  %v837_v43 = vpack.c.bf16 %v318_v36, %v317_v35  ;;  %v839_v45 = vpack.c.bf16 %v336_v40, %v335_v39 }
  0x28   :  { %854 = vmatpush3.bf16.msra.mxu1 %v853_v57  ;;  %824 = vmatprep.subr.bf16.mxu0 %v823_v58  ;;  %v368_v42 = vld [vmem:[%s1370_s3 + $0x1d8] sm:$0xff]  ;;  %v869_v44 = vpack.c.bf16 %v350_v38, %v349_v37  ;;  %v319_v46 = vld [vmem:[%s1370_s3 + $0x50] sm:$0xff]  ;;  %v337_v51 = vld [vmem:[%s1370_s3 + $0xe0] sm:$0xff] }
  0x29   :  { %186 = vmatmul.mubr.f32.gmra.mrb[2].mxu0 %v24_v2  ;;  %856 = vmatprep.subr.bf16.mxu1 %v855_v62  ;;  %v320_v47 = vld [vmem:[%s1370_s3 + $0x58] sm:$0xff]  ;;  %v351_v48 = vld [vmem:[%s1370_s3 + $0x150] sm:$0xff]  ;;  %v871_v49 = vpack.c.bf16 %v368_v42, %v367_v41  ;;  %v338_v52 = vld [vmem:[%s1370_s3 + $0xe8] sm:$0xff] }
  0x2a   :  { %275 = vmatmul.mubr.f32.gmra.mrb[2].mxu1 %v24_v2  ;;  %191 = vmatprep.mubr.f32.mxu0 %v895_v3  ;;  %v352_v50 = vld [vmem:[%s1370_s3 + $0x158] sm:$0xff]  ;;  %v369_v53 = vld [vmem:[%s1370_s3 + $0x1e0] sm:$0xff]  ;;  %v370_v54 = vld [vmem:[%s1370_s3 + $0x1e8] sm:$0xff]  ;;  %v841_v55 = vpack.c.bf16 %v320_v47, %v319_v46  ;;  %v843_v57 = vpack.c.bf16 %v338_v52, %v337_v51 }
  0x2b   :  { %280 = vmatprep.mubr.f32.mxu1 %v895_v3  ;;  %826 = vmatpush3.bf16.msra.mxu0 %v825_v6  ;;  %v873_v56 = vpack.c.bf16 %v352_v50, %v351_v48  ;;  %v875_v58 = vpack.c.bf16 %v370_v54, %v369_v53  ;;  %v321_v59 = vld [vmem:[%s1370_s3 + $0x60] sm:$0xff]  ;;  %v322_v60 = vld [vmem:[%s1370_s3 + $0x68] sm:$0xff]  ;;  %v339_v1 = vld [vmem:[%s1370_s3 + $0xf0] sm:$0xff] }
  0x2c   :  { %858 = vmatpush3.bf16.msra.mxu1 %v857_v7  ;;  %828 = vmatprep.subr.bf16.mxu0 %v827_v8  ;;  %v353_v61 = vld [vmem:[%s1370_s3 + $0x160] sm:$0xff]  ;;  %v845_v62 = vpack.c.bf16 %v322_v60, %v321_v59  ;;  %v354_v63 = vld [vmem:[%s1370_s3 + $0x168] sm:$0xff]  ;;  %v340_v2 = vld [vmem:[%s1370_s3 + $0xf8] sm:$0xff] }
  0x2d   :  { %192 = vmatmul.mubr.f32.gmra.mrb[4].mxu0 %v25_v16  ;;  %860 = vmatprep.subr.bf16.mxu1 %v859_v12  ;;  %v877_v0 = vpack.c.bf16 %v354_v63, %v353_v61  ;;  %v371_v4 = vld [vmem:[%s1370_s3 + $0x1f0] sm:$0xff]  ;;  %v847_v5 = vpack.c.bf16 %v340_v2, %v339_v1  ;;  %v372_v6 = vld [vmem:[%s1370_s3 + $0x1f8] sm:$0xff]  ;;  %v543_v1 = vld [vmem:[%s1373_s4] sm:$0xff] }
  0x2e   :  { %281 = vmatmul.mubr.f32.gmra.mrb[4].mxu1 %v25_v16  ;;  %197 = vmatprep.mubr.f32.mxu0 %v895_v3  ;;  %v323_v7 = vld [vmem:[%s1370_s3 + $0x70] sm:$0xff]  ;;  %v324_v8 = vld [vmem:[%s1370_s3 + $0x78] sm:$0xff]  ;;  %v879_v9 = vpack.c.bf16 %v372_v6, %v371_v4 }
  0x2f   :  { %286 = vmatprep.mubr.f32.mxu1 %v895_v3  ;;  %830 = vmatpush3.bf16.msra.mxu0 %v829_v19  ;;  %v867_v3 = vpack.c.bf16 %v366_v31, %v365_v30  ;;  %v849_v10 = vpack.c.bf16 %v324_v8, %v323_v7  ;;  %v355_v11 = vld [vmem:[%s1370_s3 + $0x170] sm:$0xff]  ;;  %v356_v12 = vld [vmem:[%s1370_s3 + $0x178] sm:$0xff] }
  0x30   :  { %862 = vmatpush3.bf16.msra.mxu1 %v861_v20  ;;  %832 = vmatprep.subr.bf16.mxu0 %v831_v21  ;;  %v881_v13 = vpack.c.bf16 %v356_v12, %v355_v11 }
  0x31   :  { %198 = vmatmul.mubr.f32.gmra.mrb[6].mxu0 %v26_v29  ;;  %864 = vmatprep.subr.bf16.mxu1 %v863_v25 }
  0x32   :  { %287 = vmatmul.mubr.f32.gmra.mrb[6].mxu1 %v26_v29 }
  0x33   :  { %834 = vmatpush3.bf16.msra.mxu0 %v833_v32 }
  0x34   :  { %866 = vmatpush3.bf16.msra.mxu1 %v865_v33  ;;  %836 = vmatprep.subr.bf16.mxu0 %v835_v34 }
  0x35   :  { %868 = vmatprep.subr.bf16.mxu1 %v867_v3 }
  0x37   :  { %838 = vmatpush3.bf16.msra.mxu0 %v837_v43 }
  0x38   :  { %870 = vmatpush3.bf16.msra.mxu1 %v869_v44  ;;  %840 = vmatprep.subr.bf16.mxu0 %v839_v45 }
  0x39   :  { %872 = vmatprep.subr.bf16.mxu1 %v871_v49 }
  0x3b   :  { %842 = vmatpush3.bf16.msra.mxu0 %v841_v55 }
  0x3c   :  { %874 = vmatpush3.bf16.msra.mxu1 %v873_v56  ;;  %844 = vmatprep.subr.bf16.mxu0 %v843_v57 }
  0x3d   :  { %876 = vmatprep.subr.bf16.mxu1 %v875_v58 }
  0x3f   :  { %846 = vmatpush3.bf16.msra.mxu0 %v845_v62 }
  0x40   :  { %878 = vmatpush3.bf16.msra.mxu1 %v877_v0  ;;  %848 = vmatprep.subr.bf16.mxu0 %v847_v5 }
  0x41   :  { %880 = vmatprep.subr.bf16.mxu1 %v879_v9 }
  0x43   :  { %850 = vmatpush3.bf16.msra.mxu0 %v849_v10 }
  0x44   :  { %882 = vmatpush3.bf16.msra.mxu1 %v881_v13 }
  0x93   :  { %v98_v14 = vpop.permute.xlu0 %97 }
  0x95   :  { %v108_v32 = vpop.permute.xlu1 %107 }
  0x97   :  { %v103_v23 = vpop.permute.xlu0 %102 }
  0x99   :  { %v113_v48 = vpop.permute.xlu1 %112 }
  0xf8   :  { %v181_v15 = vpop.f32.mrb[0].mxu0 }
  0xf9   :  { %v182_v16 = vadd.f32 %v181_v15, %v98_v14  ;;  %v270_v17 = vpop.f32.mrb[0].mxu1  ;;  %v183_v18 = vpop.f32.mrb[1].mxu0 }
  0xfa   :  { %v271_v19 = vadd.f32 %v270_v17, %v98_v14  ;;  %v184_v20 = vadd.f32 %v183_v18, %v98_v14  ;;  %v272_v21 = vpop.f32.mrb[1].mxu1 }
  0xfb   :  { %v273_v22 = vadd.f32 %v272_v21, %v98_v14  ;;  %v293_v26 = vmax.f32 %v182_v16, 0.0 }
  0xfc   :  { %v294_v24 = vmax.f32 %v184_v20, 0.0  ;;  %v187_v25 = vpop.f32.mrb[2].mxu0  ;;  %v295_v31 = vmax.f32 %v271_v19, 0.0 }
  0xfd   :  { %v296_v27 = vmax.f32 %v273_v22, 0.0  ;;  %v188_v28 = vadd.f32 %v187_v25, %v103_v23  ;;  %v276_v29 = vpop.f32.mrb[2].mxu1  ;;  %v189_v30 = vpop.f32.mrb[3].mxu0 }
  0xfe   :  { %v277_v33 = vadd.f32 %v276_v29, %v103_v23  ;;  %v190_v34 = vadd.f32 %v189_v30, %v103_v23  ;;  %v278_v35 = vpop.f32.mrb[3].mxu1  ;;  %437 = vmatprep.mubr.f32.mxu0 %v294_v24 }
  0xff   :  { %v279_v36 = vadd.f32 %v278_v35, %v103_v23  ;;  %522 = vmatprep.mubr.f32.mxu1 %v296_v27  ;;  %438 = vmatmul.mubr.f32.vlgmr.msra.gmra.mrb[8].mxu0 %v293_v26  ;;  %v297_v38 = vmax.f32 %v188_v28, 0.0 }
 0x100   :  { %v298_v37 = vmax.f32 %v190_v34, 0.0  ;;  %523 = vmatmul.mubr.f32.vlgmr.msra.gmra.mrb[8].mxu1 %v295_v31  ;;  %v193_v3 = vpop.f32.mrb[4].mxu0  ;;  %v299_v43 = vmax.f32 %v277_v33, 0.0  ;;  %v544_v33 = vld [vmem:[%s1373_s4 + $0x8] sm:$0xff]  ;;  %v555_v34 = vpop.permute.xlu1 %554 }
 0x101   :  { %v300_v39 = vmax.f32 %v279_v36, 0.0  ;;  %v194_v40 = vadd.f32 %v193_v3, %v108_v32  ;;  %v282_v41 = vpop.f32.mrb[4].mxu1  ;;  %v195_v42 = vpop.f32.mrb[5].mxu0 }
 0x102   :  { %v283_v44 = vadd.f32 %v282_v41, %v108_v32  ;;  %v196_v45 = vadd.f32 %v195_v42, %v108_v32  ;;  %v284_v46 = vpop.f32.mrb[5].mxu1  ;;  %442 = vmatprep.mubr.f32.mxu0 %v298_v37  ;;  %v550_v36 = vpop.permute.xlu0 %549 }
 0x103   :  { %v285_v47 = vadd.f32 %v284_v46, %v108_v32  ;;  %527 = vmatprep.mubr.f32.mxu1 %v300_v39  ;;  %443 = vmatmul.mubr.f32.gmra.mrb[10].mxu0 %v297_v38  ;;  %v301_v51 = vmax.f32 %v194_v40, 0.0 }
 0x104   :  { %v302_v49 = vmax.f32 %v196_v45, 0.0  ;;  %528 = vmatmul.mubr.f32.gmra.mrb[10].mxu1 %v299_v43  ;;  %v199_v50 = vpop.f32.mrb[6].mxu0  ;;  %v303_v56 = vmax.f32 %v283_v44, 0.0 }
 0x105   :  { %v304_v52 = vmax.f32 %v285_v47, 0.0  ;;  %v200_v53 = vadd.f32 %v199_v50, %v113_v48  ;;  %v288_v54 = vpop.f32.mrb[6].mxu1  ;;  %v201_v55 = vpop.f32.mrb[7].mxu0 }
 0x106   :  { %v289_v57 = vadd.f32 %v288_v54, %v113_v48  ;;  %v202_v58 = vadd.f32 %v201_v55, %v113_v48  ;;  %v290_v59 = vpop.f32.mrb[7].mxu1  ;;  %447 = vmatprep.mubr.f32.mxu0 %v302_v49 }
 0x107   :  { %v291_v60 = vadd.f32 %v290_v59, %v113_v48  ;;  %532 = vmatprep.mubr.f32.mxu1 %v304_v52  ;;  %448 = vmatmul.mubr.f32.gmra.mrb[12].mxu0 %v301_v51  ;;  %v305_v62 = vmax.f32 %v200_v53, 0.0 }
 0x108   :  { %v306_v61 = vmax.f32 %v202_v58, 0.0  ;;  %533 = vmatmul.mubr.f32.gmra.mrb[12].mxu1 %v303_v56  ;;  %v307_v0 = vmax.f32 %v289_v57, 0.0 }
 0x109   :  { %v308_v63 = vmax.f32 %v291_v60, 0.0 }
 0x10a   :  { %452 = vmatprep.mubr.f32.mxu0 %v306_v61 }
 0x10b   :  { %537 = vmatprep.mubr.f32.mxu1 %v308_v63  ;;  %453 = vmatmul.mubr.f32.gmra.mrb[14].mxu0 %v305_v62 }
 0x10c   :  { %538 = vmatmul.mubr.f32.gmra.mrb[14].mxu1 %v307_v0  ;;  %752 = vmatprep.mubr.msk.f32.mxu0 %vm557_vm0, %v543_v1 }
 0x1d2   :  { %v682_v2 = vpop.f32.mrb[8].mxu0 }
 0x1d3   :  { %v726_v4 = vpop.f32.mrb[8].mxu1  ;;  %v683_v5 = vpop.f32.mrb[9].mxu0 }
 0x1d4   :  { %v684_v6 = vadd.f32 %v683_v5, %v682_v2  ;;  %v727_v7 = vpop.f32.mrb[9].mxu1 }
 0x1d5   :  { %v728_v8 = vadd.f32 %v727_v7, %v726_v4 }
 0x1d6   :  { %v685_v9 = vpop.f32.mrb[10].mxu0 }
 0x1d7   :  { %v525_v10 = vadd.f32 %v728_v8, %v684_v6  ;;  %v729_v11 = vpop.f32.mrb[10].mxu1  ;;  %v686_v12 = vpop.f32.mrb[11].mxu0 }
 0x1d8   :  { %v687_v13 = vadd.f32 %v686_v12, %v685_v9  ;;  %v730_v14 = vpop.f32.mrb[11].mxu1 }
 0x1d9   :  { %v731_v15 = vadd.f32 %v730_v14, %v729_v11 }
 0x1da   :  { %v688_v16 = vpop.f32.mrb[12].mxu0 }
 0x1db   :  { %v530_v17 = vadd.f32 %v731_v15, %v687_v13  ;;  %v732_v18 = vpop.f32.mrb[12].mxu1  ;;  %v689_v19 = vpop.f32.mrb[13].mxu0 }
 0x1dc   :  { %v690_v20 = vadd.f32 %v689_v19, %v688_v16  ;;  %v733_v21 = vpop.f32.mrb[13].mxu1 }
 0x1dd   :  { %v734_v22 = vadd.f32 %v733_v21, %v732_v18  ;;  %v883_v23 = vpack.c.bf16 %v530_v17, %v525_v10 }
 0x1de   :  { %v691_v24 = vpop.f32.mrb[14].mxu0 }
 0x1df   :  { %v535_v25 = vadd.f32 %v734_v22, %v690_v20  ;;  %v735_v26 = vpop.f32.mrb[14].mxu1  ;;  %884 = vmatprep.subr.bf16.mxu0 %v883_v23  ;;  %v692_v27 = vpop.f32.mrb[15].mxu0 }
 0x1e0   :  { %v693_v28 = vadd.f32 %v692_v27, %v691_v24  ;;  %v736_v29 = vpop.f32.mrb[15].mxu1  ;;  %886 = vmatpush3.bf16.msra.mxu0 %v883_v23 }
 0x1e1   :  { %v737_v30 = vadd.f32 %v736_v29, %v735_v26 }
 0x1e3   :  { %v540_v31 = vadd.f32 %v737_v30, %v693_v28 }
 0x1e5   :  { %v887_v32 = vpack.c.bf16 %v540_v31, %v535_v25 }
 0x1e7   :  { %888 = vmatprep.subr.bf16.mxu0 %v887_v32 }
 0x1e8   :  { %890 = vmatpush3.bf16.msra.mxu0 %v887_v32 }
 0x1eb   :  { %753 = vmatmul.mubr.msk.f32.vlgmr.msra.gmra.mrb[16].mxu0 %vm557_vm0, %v544_v33 }
 0x2be   :  { %v754_v35 = vpop.f32.mrb[16].mxu0 }
 0x2bf   :  { %v636_v37 = vadd.f32 %v754_v35, %v555_v34  ;;  %v630_v3 = vpop.f32.mrb[17].mxu0 }
 0x2c0   :  { %v631_v38 = vadd.f32 %v630_v3, %v550_v36 }
 0x2c1   :  { %v640_v39 = vmax.f32 %v636_v37, 0.0 }
 0x2c2   :  { %v639_v40 = vmax.f32 %v631_v38, 0.0 }
 0x2c3   :  { %643 = vst.msk [vmem:[%s1374_s6 + $0x8] sm:$0xff] %vm641_vm1, %v640_v39 }
 0x2c4   :  { %642 = vst.msk [vmem:[%s1374_s6] sm:$0xff] %vm641_vm1, %v639_v40 }

</bundles_post_ra>
